<compile_context>
chip_gen: v5e
topology: v5e:2x2
jax: 0.10.0
libtpu: 0.0.40
codegen_flags: <defaults>
</compile_context>

<pallas_src>
import functools

import jax
import jax.numpy as jnp
from jax import lax
from jax.experimental import pallas as pl
from jax.experimental.pallas import tpu as pltpu

# GaussActivation / MaskUpdate parameters after the clamps in the PyTorch code.
GAUSS_A = 1.1
GAUSS_MU = 2.0
GAUSS_SIGMA1 = 1.0
GAUSS_SIGMA2 = 1.0
MASK_ALPHA = 0.8

# The single-exp GaussActivation in the kernel relies on this.
assert GAUSS_SIGMA1 == GAUSS_SIGMA2


def _round_up(x, m):
    return ((x + m - 1) // m) * m


# --------------------------------------------------------------------------- #
# Kernel
# --------------------------------------------------------------------------- #
def _fwd_attn_kernel(cout, pat_f_ref, pat_m_ref, w1_ref, w2_ref, out_ref):
    """Two exact MXU matmuls + all elementwise math + one merged store.

    pat_f_ref: (tm, Cin*K*K)   feature patches, (kh, kw, c) minor order
    pat_m_ref: (tm, Cm *K*K)   mask patches,    (kh, kw, c) minor order
    w1_ref:    (Cin*K*K, Cout) conv weight rows in matching order
    w2_ref:    (Cm *K*K, Cout) maskConv weight rows in matching order
    out_ref:   (tm, 4*Cout)    [convOut | maskUpdate | convFeatures | maskActiv]
    """
    conv_f = jnp.dot(pat_f_ref[...], w1_ref[...],
                     preferred_element_type=jnp.float32)
    mask_f = jnp.dot(pat_m_ref[...], w2_ref[...],
                     preferred_element_type=jnp.float32)

    # GaussActivation (asymmetric Gaussian).  One EUP exp is enough because
    # sigma1 == sigma2 after the module's clamps; if distinct sigmas are ever
    # passed at runtime the two-exponential form must be restored.
    e = jnp.exp(-GAUSS_SIGMA1 * (mask_f - GAUSS_MU) ** 2)
    mask_activ = jnp.where(mask_f < GAUSS_MU,
                           GAUSS_A * e,
                           1.0 + (GAUSS_A - 1.0) * e)

    conv_out = conv_f * mask_activ

    # MaskUpdate: relu(x) ** alpha via a guarded exp/log so x <= 0 (and the
    # garbage tail rows of a partial final block) never feeds log().
    pos = mask_f > 0.0
    safe = jnp.where(pos, mask_f, 1.0)
    mask_update = jnp.where(pos, jnp.exp(MASK_ALPHA * jnp.log(safe)), 0.0)

    od = out_ref.dtype
    out_ref[:, 0 * cout:1 * cout] = conv_out.astype(od)
    out_ref[:, 1 * cout:2 * cout] = mask_update.astype(od)
    out_ref[:, 2 * cout:3 * cout] = conv_f.astype(od)
    out_ref[:, 3 * cout:4 * cout] = mask_activ.astype(od)


# --------------------------------------------------------------------------- #
# Wrapper-side helpers
# --------------------------------------------------------------------------- #
def _im2col_nhwc(x_nhwc, k, stride, padding):
    """(N, H, W, C) -> (N*Hout*Wout, K*K*C) patches, (kh, kw, c) minor order.

    Taps are concatenated on the minor axis, so no transpose of the expanded
    patch array is needed, and no row padding (the grid handles the ragged
    tail block).
    """
    n, h, w, c = x_nhwc.shape
    xp = jnp.pad(x_nhwc, ((0, 0), (padding, padding), (padding, padding),
                          (0, 0)))
    hout = (h + 2 * padding - k) // stride + 1
    wout = (w + 2 * padding - k) // stride + 1
    taps = []
    for kh in range(k):
        for kw in range(k):
            taps.append(xp[:, kh:kh + stride * hout:stride,
                           kw:kw + stride * wout:stride, :])
    pat = jnp.concatenate(taps, axis=-1)                # (N, Hout, Wout, K*K*C)
    return pat.reshape(n * hout * wout, k * k * c), hout, wout


def _weight_to_patch_layout(w, dtype):
    """(Cout, Cin, Kh, Kw) -> (Kh*Kw*Cin, Cout), rows ordered (kh, kw, c)."""
    cout = w.shape[0]
    return w.transpose(2, 3, 1, 0).reshape(-1, cout).astype(dtype)


def _vmem_budget_bytes():
    """Per-generation VMEM budget: ~75% of capacity (v7x: ~48 MiB of 64,
    v5e/v6e: ~96 MiB of 128). Falls back to a v7x-safe 48 MiB."""
    try:
        info = pltpu.get_tpu_info()
        cap = int(getattr(info, "vmem_capacity_bytes", 0)) or (64 << 20)
    except Exception:  # pragma: no cover - conservative fallback
        cap = 64 << 20
    return min((cap * 3) // 4, 100 << 20)


def _derive_tile_rows(m, kc_total, cout, mm_itemsize, out_itemsize, budget):
    """Largest M-tile that fits the VMEM budget, with >= 4 grid steps."""
    w_bytes = 2 * kc_total * cout * mm_itemsize           # weights (dbl-buffered)
    per_row = 2 * kc_total * mm_itemsize + 2 * 4 * cout * out_itemsize
    avail = budget - w_bytes
    if avail > 0:
        tm_vmem = max(16, (avail // max(per_row, 1)) // 16 * 16)
    else:
        # TODO(synk): add kc-reduction grid axis instead of shrinking tm.
        tm_vmem = 16
    # >= 4 steps so each v7x TensorCore gets >= 2 pipelined iterations.
    tm_steps = max(16, _round_up(pl.cdiv(m, 4), 16))
    return int(min(1024, tm_vmem, tm_steps))


# --------------------------------------------------------------------------- #
# Public entry point
# --------------------------------------------------------------------------- #
@functools.partial(
    jax.jit,
    static_argnames=("kernel_size", "stride", "padding", "data_format",
                     "matmul_dtype", "out_dtype"))
def forward_attention_layer(input_features, input_masks, conv_w, mask_conv_w,
                            *, kernel_size, stride, padding,
                            data_format="NCHW", matmul_dtype=jnp.bfloat16,
                            out_dtype=jnp.float32):
    """Pallas implementation of ForwardAttentionLayer.forward.

    input_features: (N, Cin, H, W)   (NCHW, like PyTorch)
    input_masks:    (N, Cm,  H, W)
    conv_w:         (Cout, Cin, K, K)
    mask_conv_w:    (Cout, Cm,  K, K)
    Returns (convOut, maskUpdate, convFeatures, maskActiv); NCHW by default
    (PyTorch-compatible) or NHWC (transpose-free, for chained LBAM layers).
    """
    n, _, _, _ = input_features.shape
    cout = conv_w.shape[0]
    k = kernel_size

    # NCHW -> NHWC on the raw (1x) inputs; cast to the matmul dtype BEFORE the
    # 4x im2col expansion so the expanded patches are already narrow.
    x_f = input_features.transpose(0, 2, 3, 1).astype(matmul_dtype)
    x_m = input_masks.transpose(0, 2, 3, 1).astype(matmul_dtype)

    pat_f, hout, wout = _im2col_nhwc(x_f, k, stride, padding)
    pat_m, _, _ = _im2col_nhwc(x_m, k, stride, padding)
    m, kc_f = pat_f.shape
    kc_m = pat_m.shape[1]

    w1 = _weight_to_patch_layout(conv_w, matmul_dtype)       # (kc_f, Cout)
    w2 = _weight_to_patch_layout(mask_conv_w, matmul_dtype)  # (kc_m, Cout)

    budget = _vmem_budget_bytes()
    tm = _derive_tile_rows(m, kc_f + kc_m, cout,
                           jnp.dtype(matmul_dtype).itemsize,
                           jnp.dtype(out_dtype).itemsize, budget)
    grid = (pl.cdiv(m, tm),)   # partial last block; tail rows masked/discarded

    merged = pl.pallas_call(
        functools.partial(_fwd_attn_kernel, cout),
        out_shape=jax.ShapeDtypeStruct((m, 4 * cout), out_dtype),
        grid_spec=pltpu.PrefetchScalarGridSpec(
            num_scalar_prefetch=0,
            grid=grid,
            in_specs=[
                pl.BlockSpec((tm, kc_f), lambda i: (i, 0)),      # feat patches
                pl.BlockSpec((tm, kc_m), lambda i: (i, 0)),      # mask patches
                pl.BlockSpec((kc_f, cout), lambda i: (0, 0)),    # conv weight
                pl.BlockSpec((kc_m, cout), lambda i: (0, 0)),    # mask weight
            ],
            out_specs=pl.BlockSpec((tm, 4 * cout), lambda i: (i, 0)),
        ),
        compiler_params=pltpu.CompilerParams(
            dimension_semantics=("parallel",),
            vmem_limit_bytes=int(budget)),
    )(pat_f, pat_m, w1, w2)

    # Split the merged (M, 4*Cout) slab: NHWC is transpose-free; NCHW needs a
    # single transpose back (PyTorch-compatible default).
    merged = merged.reshape(n, hout, wout, 4, cout)
    if data_format == "NHWC":
        return tuple(merged[..., j, :] for j in range(4))
    y = merged.transpose(3, 0, 4, 1, 2)        # (4, N, Cout, Hout, Wout)
    return y[0], y[1], y[2], y[3]              # convOut, maskUpdate, convFeat, maskActiv


# --------------------------------------------------------------------------- #
# Pure-JAX reference (literal form of the PyTorch module) for validation
# --------------------------------------------------------------------------- #
def _reference(input_features, input_masks, conv_w, mask_conv_w,
               kernel_size, stride, padding, matmul_dtype):
    dn = ("NCHW", "OIHW", "NCHW")
    pad = [(padding, padding), (padding, padding)]
    conv_f = lax.conv_general_dilated(
        input_features.astype(matmul_dtype), conv_w.astype(matmul_dtype),
        (stride, stride), pad, dimension_numbers=dn,
        preferred_element_type=jnp.float32)
    mask_f = lax.conv_general_dilated(
        input_masks.astype(matmul_dtype), mask_conv_w.astype(matmul_dtype),
        (stride, stride), pad, dimension_numbers=dn,
        preferred_element_type=jnp.float32)
    diff2 = (mask_f - GAUSS_MU) ** 2
    left = GAUSS_A * jnp.exp(-GAUSS_SIGMA1 * diff2)
    right = 1.0 + (GAUSS_A - 1.0) * jnp.exp(-GAUSS_SIGMA2 * diff2)
    mask_activ = jnp.where(mask_f < GAUSS_MU, left, right)
    conv_out = conv_f * mask_activ
    mask_update = jnp.power(jnp.maximum(mask_f, 0.0), MASK_ALPHA)
    return conv_out, mask_update, conv_f, mask_activ


if __name__ == "__main__":
    # LBAM-style first layer (shrunk): inputChannels=4 -> mask branch takes 3.
    N, CIN, COUT = 2, 4, 32
    K, STRIDE, PADDING = 4, 2, 1
    CM = 3 if CIN == 4 else CIN

    key = jax.random.PRNGKey(0)
    k_x, k_m, k_w1, k_w2 = jax.random.split(key, 4)

    def make_inputs(h, w):
        x = jax.random.normal(k_x, (N, CIN, h, w), jnp.float32)
        mk = jax.random.uniform(k_m, (N, CM, h, w), jnp.float32)
        return x, mk

    # weights_init() in LBAM uses N(0, 0.02) for conv layers.
    conv_w = 0.02 * jax.random.normal(k_w1, (COUT, CIN, K, K), jnp.float32)
    mask_conv_w = 0.02 * jax.random.normal(k_w2, (COUT, CM, K, K), jnp.float32)

    def check(outs, refs, atols, rtol):
        names = ("convOut", "maskUpdate", "convFeatures", "maskActiv")
        for name, got, want, atol in zip(names, outs, refs, atols):
            got32 = jnp.asarray(got, jnp.float32)
            want32 = jnp.asarray(want, jnp.float32)
            assert got32.shape == want32.shape, (name, got32.shape, want32.shape)
            ok = bool(jnp.allclose(got32, want32, atol=atol, rtol=rtol))
            assert ok, (name, float(jnp.max(jnp.abs(got32 - want32))))

    # maskUpdate gets a looser atol: d/dx x**0.8 -> inf at 0, so tiny matmul
    # rounding differences near zero are amplified by the reference pow.
    TOLS = (1e-2, 2e-2, 1e-2, 1e-2)

    # --- Run A: default bf16 matmul, f32 outputs, NCHW (PyTorch-compatible) --
    x, mk = make_inputs(16, 16)
    outs = forward_attention_layer(x, mk, conv_w, mask_conv_w,
                                   kernel_size=K, stride=STRIDE,
                                   padding=PADDING)
    outs = jax.block_until_ready(outs)
    refs = _reference(x, mk, conv_w, mask_conv_w, K, STRIDE, PADDING,
                      matmul_dtype=jnp.bfloat16)
    check(outs, refs, atols=TOLS, rtol=5e-3)

    # --- Run B: validated float32 matmul path --------------------------------
    outs32 = forward_attention_layer(x, mk, conv_w, mask_conv_w,
                                     kernel_size=K, stride=STRIDE,
                                     padding=PADDING,
                                     matmul_dtype=jnp.float32)
    outs32 = jax.block_until_ready(outs32)
    refs32 = _reference(x, mk, conv_w, mask_conv_w, K, STRIDE, PADDING,
                        matmul_dtype=jnp.float32)
    check(outs32, refs32, atols=TOLS, rtol=5e-3)

    # --- Run C: bf16 outputs, NHWC (chained-layer path), ragged last block ---
    x2, mk2 = make_inputs(18, 18)     # M=162 -> exercises the partial block
    outs_nhwc = forward_attention_layer(
        x2, mk2, conv_w, mask_conv_w, kernel_size=K, stride=STRIDE,
        padding=PADDING, data_format="NHWC", out_dtype=jnp.bfloat16)
    outs_nhwc = jax.block_until_ready(outs_nhwc)
    refs2 = _reference(x2, mk2, conv_w, mask_conv_w, K, STRIDE, PADDING,
                       matmul_dtype=jnp.bfloat16)
    refs2_nhwc = tuple(r.transpose(0, 2, 3, 1) for r in refs2)
    check(outs_nhwc, refs2_nhwc, atols=(3e-2, 3e-2, 3e-2, 3e-2), rtol=2e-2)

    print("KERNEL_OK")
</pallas_src>

<mosaic_0001>
module attributes {stable_mosaic.version = 11 : i64} {
  func.func @_fwd_attn_kernel(%arg0: i32, %arg1: memref<32x64xbf16, #tpu.memory_space<vmem>>, %arg2: memref<32x48xbf16, #tpu.memory_space<vmem>>, %arg3: memref<64x32xbf16, #tpu.memory_space<vmem>>, %arg4: memref<48x32xbf16, #tpu.memory_space<vmem>>, %arg5: memref<32x128xf32, #tpu.memory_space<vmem>>) attributes {dimension_semantics = [#tpu.dimension_semantics<parallel>], iteration_bounds = array<i64: 4>, scalar_prefetch = 0 : i64, scratch_operands = 0 : i64, tpu.core_type = #tpu.core_type<tc>, window_params = [{transform_indices = @transform_0, window_bounds = array<i64: 32, 64>}, {transform_indices = @transform_1, window_bounds = array<i64: 32, 48>}, {pipeline_mode = #tpu.pipeline_mode<synchronous>, transform_indices = @transform_2, window_bounds = array<i64: 64, 32>}, {pipeline_mode = #tpu.pipeline_mode<synchronous>, transform_indices = @transform_3, window_bounds = array<i64: 48, 32>}, {transform_indices = @transform_4, window_bounds = array<i64: 32, 128>}]} {
    %c0 = arith.constant 0 : index
    %c0_0 = arith.constant 0 : index
    %0 = vector.load %arg1[%c0, %c0_0] : memref<32x64xbf16, #tpu.memory_space<vmem>>, vector<32x64xbf16>
    %c0_1 = arith.constant 0 : index
    %c0_2 = arith.constant 0 : index
    %1 = vector.load %arg3[%c0_1, %c0_2] : memref<64x32xbf16, #tpu.memory_space<vmem>>, vector<64x32xbf16>
    %cst = arith.constant dense<0.000000e+00> : vector<32x32xf32>
    %2 = tpu.matmul %0, %1, %cst {dimension_numbers = #tpu.dot_dimension_numbers<[1], [0], [0], [1], [0, 0, 1, 1], [], []>} : vector<32x64xbf16>, vector<64x32xbf16>, vector<32x32xf32> -> vector<32x32xf32>
    %c0_3 = arith.constant 0 : index
    %c0_4 = arith.constant 0 : index
    %3 = vector.load %arg2[%c0_3, %c0_4] : memref<32x48xbf16, #tpu.memory_space<vmem>>, vector<32x48xbf16>
    %c0_5 = arith.constant 0 : index
    %c0_6 = arith.constant 0 : index
    %4 = vector.load %arg4[%c0_5, %c0_6] : memref<48x32xbf16, #tpu.memory_space<vmem>>, vector<48x32xbf16>
    %cst_7 = arith.constant dense<0.000000e+00> : vector<32x32xf32>
    %5 = tpu.matmul %3, %4, %cst_7 {dimension_numbers = #tpu.dot_dimension_numbers<[1], [0], [0], [1], [0, 0, 1, 1], [], []>} : vector<32x48xbf16>, vector<48x32xbf16>, vector<32x32xf32> -> vector<32x32xf32>
    %cst_8 = arith.constant 2.000000e+00 : f32
    %6 = vector.broadcast %cst_8 : f32 to vector<32x32xf32>
    %7 = arith.subf %5, %6 : vector<32x32xf32>
    %8 = arith.mulf %7, %7 : vector<32x32xf32>
    %cst_9 = arith.constant -1.000000e+00 : f32
    %9 = vector.broadcast %cst_9 : f32 to vector<32x32xf32>
    %10 = arith.mulf %9, %8 : vector<32x32xf32>
    %11 = math.exp %10 : vector<32x32xf32>
    %cst_10 = arith.constant 2.000000e+00 : f32
    %12 = vector.broadcast %cst_10 : f32 to vector<32x32xf32>
    %13 = arith.cmpf olt, %5, %12 : vector<32x32xf32>
    %cst_11 = arith.constant 1.100000e+00 : f32
    %14 = vector.broadcast %cst_11 : f32 to vector<32x32xf32>
    %15 = arith.mulf %14, %11 : vector<32x32xf32>
    %cst_12 = arith.constant 1.000000e-01 : f32
    %16 = vector.broadcast %cst_12 : f32 to vector<32x32xf32>
    %17 = arith.mulf %16, %11 : vector<32x32xf32>
    %cst_13 = arith.constant 1.000000e+00 : f32
    %18 = vector.broadcast %cst_13 : f32 to vector<32x32xf32>
    %19 = arith.addf %18, %17 : vector<32x32xf32>
    %20 = arith.select %13, %15, %19 : vector<32x32xi1>, vector<32x32xf32>
    %21 = arith.mulf %2, %20 : vector<32x32xf32>
    %cst_14 = arith.constant 0.000000e+00 : f32
    %22 = vector.broadcast %cst_14 : f32 to vector<32x32xf32>
    %23 = arith.cmpf ogt, %5, %22 : vector<32x32xf32>
    %cst_15 = arith.constant 1.000000e+00 : f32
    %24 = vector.broadcast %cst_15 : f32 to vector<32x32xf32>
    %25 = arith.select %23, %5, %24 : vector<32x32xi1>, vector<32x32xf32>
    %26 = math.log %25 : vector<32x32xf32>
    %cst_16 = arith.constant 8.000000e-01 : f32
    %27 = vector.broadcast %cst_16 : f32 to vector<32x32xf32>
    %28 = arith.mulf %27, %26 : vector<32x32xf32>
    %29 = math.exp %28 : vector<32x32xf32>
    %cst_17 = arith.constant 0.000000e+00 : f32
    %30 = vector.broadcast %cst_17 : f32 to vector<32x32xf32>
    %31 = arith.select %23, %29, %30 : vector<32x32xi1>, vector<32x32xf32>
    %c0_18 = arith.constant 0 : index
    %c0_19 = arith.constant 0 : index
    %32 = vector.load %arg5[%c0_18, %c0_19] : memref<32x128xf32, #tpu.memory_space<vmem>>, vector<32x32xf32>
    tpu.vector_store %arg5[%c0_18, %c0_19], %21 {strides = array<i32>} : memref<32x128xf32, #tpu.memory_space<vmem>>, vector<32x32xf32>,
    %c0_20 = arith.constant 0 : index
    %c32 = arith.constant 32 : index
    %33 = vector.load %arg5[%c0_20, %c32] : memref<32x128xf32, #tpu.memory_space<vmem>>, vector<32x32xf32>
    tpu.vector_store %arg5[%c0_20, %c32], %31 {strides = array<i32>} : memref<32x128xf32, #tpu.memory_space<vmem>>, vector<32x32xf32>,
    %c0_21 = arith.constant 0 : index
    %c64 = arith.constant 64 : index
    %34 = vector.load %arg5[%c0_21, %c64] : memref<32x128xf32, #tpu.memory_space<vmem>>, vector<32x32xf32>
    tpu.vector_store %arg5[%c0_21, %c64], %2 {strides = array<i32>} : memref<32x128xf32, #tpu.memory_space<vmem>>, vector<32x32xf32>,
    %c0_22 = arith.constant 0 : index
    %c96 = arith.constant 96 : index
    %35 = vector.load %arg5[%c0_22, %c96] : memref<32x128xf32, #tpu.memory_space<vmem>>, vector<32x32xf32>
    tpu.vector_store %arg5[%c0_22, %c96], %20 {strides = array<i32>} : memref<32x128xf32, #tpu.memory_space<vmem>>, vector<32x32xf32>,
    return
  }
  func.func @transform_0(%arg0: i32) -> (i32, i32) {
    %c0_i32 = arith.constant 0 : i32
    %c0_i32_0 = arith.constant 0 : i32
    return %arg0, %c0_i32 : i32, i32
  }
  func.func @transform_1(%arg0: i32) -> (i32, i32) {
    %c0_i32 = arith.constant 0 : i32
    %c0_i32_0 = arith.constant 0 : i32
    return %arg0, %c0_i32 : i32, i32
  }
  func.func @transform_2(%arg0: i32) -> (i32, i32) {
    %c0_i32 = arith.constant 0 : i32
    %c0_i32_0 = arith.constant 0 : i32
    %c0_i32_1 = arith.constant 0 : i32
    return %c0_i32, %c0_i32_0 : i32, i32
  }
  func.func @transform_3(%arg0: i32) -> (i32, i32) {
    %c0_i32 = arith.constant 0 : i32
    %c0_i32_0 = arith.constant 0 : i32
    %c0_i32_1 = arith.constant 0 : i32
    return %c0_i32, %c0_i32_0 : i32, i32
  }
  func.func @transform_4(%arg0: i32) -> (i32, i32) {
    %c0_i32 = arith.constant 0 : i32
    %c0_i32_0 = arith.constant 0 : i32
    return %arg0, %c0_i32 : i32, i32
  }
}

</mosaic_0001>

<bundles_post_ra>
// kernel: forward_attention_layer.1
= control target key start
LH: loop header
LB: loop body
LE: loop exit
PB: predicated region body
PF: predicated region fallthrough
CT: control target
= control target key end

     0   :  { %s726_s15 = smov 0   ;;  %s865_s0 = inlined_call_operand.vmem [shape: bf16[128,64], index: 0, kind: input, shape index: {}]   ;;  %s866_s1 = inlined_call_operand.vmem [shape: bf16[128,48], index: 1, kind: input, shape index: {}]   ;;  %s867_s2 = inlined_call_operand.vmem [shape: bf16[64,32], index: 2, kind: input, shape index: {}]   ;;  %s868_s3 = inlined_call_operand.vmem [shape: bf16[48,32], index: 3, kind: input, shape index: {}]   ;;  %s869_s4 = inlined_call_operand.vmem [shape: f32[128,128], index: 4, kind: output, shape index: {}]  }
   0x1 LB: > { %s572_s16 = sadd.s32 4294967295, %s696_s15   ;;  %p576_p0 = scmp.ge.s32.totalorder %s696_s15, 1  ;;  %s696_s15 = sphi %s726_s15, %s14_s15  }
   0x2   : > { %p174_p1 = scmp.lt.s32.totalorder %s696_s15, 5 }
   0x4   : > { %p175_p2 = pnand %p576_p0, %p174_p1 }
   0x5   : > { %s577_s21 = sshll.u32 (!%p175_p2), %s572_s16, 2  ;;  %s698_s13 = smov (!%p175_p2), 64  }
   0x6   : > { %178 = sbr.rel (%p175_p2) target bundleno = 313 (0x139), region = 36  ;;  %p206_p3 = scmp.lt.s32.totalorder (!%p175_p2), %s577_s21, 15 }
   0x7   : > { %s699_s19 = smov (!%p175_p2), 96   ;;  %s700_s20 = smov (!%p175_p2), 32  }
   0xb   : > { %v642_v0 = vld [vmem:[%s867_s2 + $0x18] sm:$0xff]  ;;  %v647_v1 = vld [vmem:[%s868_s3 + $0x10] sm:$0xff]  ;;  %v646_v3 = vld [vmem:[%s868_s3 + $0x8] sm:$0xff]  ;;  %s871_s21 = smov (!%p206_p3, %s577_s21), 15  ;;  %vm334_vm0 = vcmask 392192   ;;  %vm270_vm1 = vcmask 523264  }
   0xc   : > { %281 = vmatpush.bf16.msra.mxu0 %v642_v0  ;;  %648 = vmatpush.bf16.msra.mxu2 %v642_v0  ;;  %v641_v2 = vld [vmem:[%s867_s2 + $0x10] sm:$0xff]  ;;  %s578_s26 = sshll.u32 %s871_s21, 2  ;;  %v640_v4 = vld [vmem:[%s867_s2 + $0x8] sm:$0xff]  ;;  %v645_v5 = vld [vmem:[%s868_s3] sm:$0xff]  ;;  %s582_s14 = sshll.u32 %s871_s21, 3  ;;  %vm436_vm7 = vcmask 261120  }
   0xd   : > { %346 = vmatpush.bf16.msra.mxu1 %v647_v1  ;;  %652 = vmatpush.bf16.msra.mxu3 %v647_v1  ;;  %s215_s7 = scalar_lea.vmem %s866_s1, %s578_s26  ;;  %v639_v8 = vld [vmem:[%s867_s2] sm:$0xff]  ;;  %s209_s12 = scalar_lea.vmem %s865_s0, %s578_s26  ;;  %vm457_vm11 = vcmask 523520   ;;  %vm478_vm12 = vcmask 785920   ;;  %vm499_vm13 = vcmask 1048320  }
   0xe   : > { %v643_v6 = vld [vmem:[%s215_s7] sm:$0xff]  ;;  %v644_v7 = vld [vmem:[%s215_s7 + $0x8] sm:$0xff]  ;;  %s807_s18 = scalar_lea.vmem %s869_s4, %s582_s14 }
   0xf   : > { %v637_v9 = vld [vmem:[%s209_s12] sm:$0xff]  ;;  %v638_v10 = vld [vmem:[%s209_s12 + $0x8] sm:$0xff] }
  0x10   : > { %282 = vmatpush.bf16.msra.mxu0 %v641_v2  ;;  %649 = vmatpush.bf16.msra.mxu2 %v641_v2 }
  0x11   : > { %347 = vmatpush.bf16.msra.mxu1 %v646_v3  ;;  %653 = vmatpush.bf16.msra.mxu3 %v646_v3 }
  0x14   : > { %283 = vmatpush.bf16.msra.mxu0 %v640_v4  ;;  %650 = vmatpush.bf16.msra.mxu2 %v640_v4 }
  0x15   : > { %348 = vmatpush.bf16.msra.mxu1 %v645_v5  ;;  %654 = vmatpush.bf16.msra.mxu3 %v645_v5 }
  0x18   : > { %629 = vmatmul.msk.bf16.vlgmr.msra.gmra.mxu1 %vm334_vm0, %v643_v6  ;;  %630 = vmatmul.msk.bf16.vlgmr.msra.gmra.mxu3 %vm334_vm0, %v644_v7 }
  0x19   : > { %284 = vmatpush.bf16.msra.mxu0 %v639_v8  ;;  %651 = vmatpush.bf16.msra.mxu2 %v639_v8 }
  0x1c   : > { %607 = vmatmul.msk.bf16.vlgmr.msra.gmra.mxu0 %vm270_vm1, %v637_v9  ;;  %608 = vmatmul.msk.bf16.vlgmr.msra.gmra.mxu2 %vm270_vm1, %v638_v10 }
  0x95   : > { %v764_v11 = vpop.f32.mrf.mxu1 }
  0x96   : > { %v631_v12 = vadd.f32 -2.0, %v764_v11  ;;  %vm404_vm2 = vcmp.gt.f32.partialorder %v764_v11, 0.0  ;;  %vm380_vm6 = vcmp.lt.f32.partialorder %v764_v11, 2.0 }
  0x97   : > { %v408_v13 = vsel %vm404_vm2, %v764_v11, 1.0 }
  0x98   : > { %v364_v14 = vmul.f32 %v631_v12, %v631_v12  ;;  %666 = vlog2.f32 %v408_v13 }
  0x99   : > { %v286_v15 = vpop.f32.mrf.mxu0 }
  0x9a   : > { %v368_v16 = vmul.f32 -1.0, %v364_v14  ;;  %466 = vrot.lane.b32.xlu2 %v286_v15, %s698_s13 }
  0x9b   : > { %v772_v17 = vpop.f32.mrf.mxu3 }
  0x9c   : > { %v372_v18 = vmul.f32 1.442695, %v368_v16  ;;  %v633_v19 = vadd.f32 -2.0, %v772_v17  ;;  %vm406_vm3 = vcmp.gt.f32.partialorder %v772_v17, 0.0  ;;  %vm382_vm8 = vcmp.lt.f32.partialorder %v772_v17, 2.0 }
  0x9d   : > { %v776_v20 = vpop.f32.mrf.mxu1  ;;  %v410_v21 = vsel %vm406_vm3, %v772_v17, 1.0 }
  0x9e   : > { %v667_v22 = vpop.eup %666  ;;  %668 = vpow2.f32 %v372_v18  ;;  %v366_v23 = vmul.f32 %v633_v19, %v633_v19  ;;  %v632_v24 = vadd.f32 -2.0, %v776_v20  ;;  %vm405_vm4 = vcmp.gt.f32.partialorder %v776_v20, 0.0 }
  0x9f   : > { %v782_v25 = vpop.f32.mrf.mxu2  ;;  %v413_v26 = vmul.f32 0.6931472, %v667_v22  ;;  %670 = vlog2.f32 %v410_v21  ;;  %v409_v29 = vsel %vm405_vm4, %v776_v20, 1.0  ;;  %vm381_vm9 = vcmp.lt.f32.partialorder %v776_v20, 2.0 }
  0xa0   : > { %v370_v27 = vmul.f32 -1.0, %v366_v23  ;;  %v365_v28 = vmul.f32 %v632_v24, %v632_v24  ;;  %470 = vrot.lane.b32.xlu0 %v782_v25, %s698_s13  ;;  %672 = vlog2.f32 %v409_v29 }
  0xa1   : > { %v790_v30 = vpop.f32.mrf.mxu0  ;;  %v420_v31 = vmul.f32 0.8, %v413_v26 }
  0xa2   : > { %v376_v32 = vmul.f32 1.442695, %v370_v27  ;;  %v369_v33 = vmul.f32 -1.0, %v365_v28  ;;  %468 = vrot.lane.b32.xlu2 %v790_v30, %s698_s13 }
  0xa3   : > { %v794_v34 = vpop.f32.mrf.mxu3  ;;  %v424_v35 = vmul.f32 1.442695, %v420_v31 }
  0xa4   : > { %v669_v36 = vpop.eup %668  ;;  %674 = vpow2.f32 %v376_v32  ;;  %v374_v37 = vmul.f32 1.442695, %v369_v33  ;;  %v634_v38 = vadd.f32 -2.0, %v794_v34  ;;  %vm407_vm5 = vcmp.gt.f32.partialorder %v794_v34, 0.0 }
  0xa5   : > { %v671_v39 = vpop.eup %670  ;;  %v384_v40 = vmul.f32 1.1, %v669_v36  ;;  %v388_v41 = vmul.f32 0.1, %v669_v36  ;;  %676 = vpow2.f32 %v424_v35  ;;  %v411_v44 = vsel %vm407_vm5, %v794_v34, 1.0 }
  0xa6   : > { %678 = vpow2.f32 %v374_v37  ;;  %v367_v42 = vmul.f32 %v634_v38, %v634_v38  ;;  %v417_v43 = vmul.f32 0.6931472, %v671_v39  ;;  %v673_v45 = vpop.eup %672  ;;  %vm383_vm10 = vcmp.lt.f32.partialorder %v794_v34, 2.0 }
  0xa7   : > { %v392_v46 = vadd.f32 1.0, %v388_v41  ;;  %v293_v47 = vpop.f32.mrf.mxu2  ;;  %680 = vlog2.f32 %v411_v44  ;;  %v415_v50 = vmul.f32 0.6931472, %v673_v45 }
  0xa8   : > { %v371_v48 = vmul.f32 -1.0, %v367_v42  ;;  %472 = vrot.lane.b32.xlu1 %v293_v47, %s698_s13  ;;  %v422_v49 = vmul.f32 0.8, %v417_v43 }
  0xa9   : > { %v396_v51 = vsel %vm380_vm6, %v384_v40, %v392_v46  ;;  %v421_v56 = vmul.f32 0.8, %v415_v50 }
  0xaa   : > { %v675_v52 = vpop.eup %674  ;;  %v400_v53 = vmul.f32 %v396_v51, %v286_v15  ;;  %v378_v54 = vmul.f32 1.442695, %v371_v48  ;;  %487 = vrot.lane.b32.xlu2 %v396_v51, %s699_s19  ;;  %v428_v55 = vmul.f32 1.442695, %v422_v49 }
  0xab   : > { %v677_v57 = vpop.eup %676  ;;  %v390_v58 = vmul.f32 0.1, %v675_v52  ;;  %v426_v61 = vmul.f32 1.442695, %v421_v56  ;;  %v386_v63 = vmul.f32 1.1, %v675_v52 }
  0xac   : > { %v679_v59 = vpop.eup %678  ;;  %437 = vst.msk [vmem:[%s807_s18] sm:$0xff] %vm436_vm7, %v400_v53  ;;  %682 = vpow2.f32 %v378_v54  ;;  %v432_v60 = vsel %vm404_vm2, %v677_v57, 0.0 }
  0xad   : > { %v681_v62 = vpop.eup %680  ;;  %v394_v0 = vadd.f32 1.0, %v390_v58  ;;  %v389_v1 = vmul.f32 0.1, %v679_v59  ;;  %445 = vrot.lane.b32.xlu0 %v432_v60, %s700_s20  ;;  %684 = vpow2.f32 %v428_v55  ;;  %v385_v4 = vmul.f32 1.1, %v679_v59 }
  0xae   : > { %686 = vpow2.f32 %v426_v61  ;;  %v419_v2 = vmul.f32 0.6931472, %v681_v62 }
  0xaf   : > { %v398_v3 = vsel %vm382_vm8, %v386_v63, %v394_v0  ;;  %v393_v5 = vadd.f32 1.0, %v389_v1 }
  0xb0   : > { %v402_v6 = vmul.f32 %v398_v3, %v782_v25  ;;  %v423_v7 = vmul.f32 0.8, %v419_v2 }
  0xb1   : > { %v397_v8 = vsel %vm381_vm9, %v385_v4, %v393_v5 }
  0xb2   : > { %v683_v9 = vpop.eup %682  ;;  %439 = vst.msk [vmem:[%s807_s18 + $0x10] sm:$0xff] %vm436_vm7, %v402_v6  ;;  %v401_v10 = vmul.f32 %v397_v8, %v790_v30  ;;  %v430_v11 = vmul.f32 1.442695, %v423_v7 }
  0xb3   : > { %v685_v12 = vpop.eup %684  ;;  %v391_v13 = vmul.f32 0.1, %v683_v9  ;;  %v387_v16 = vmul.f32 1.1, %v683_v9 }
  0xb4   : > { %v687_v14 = vpop.eup %686  ;;  %438 = vst.msk [vmem:[%s807_s18 + $0x8] sm:$0xff] %vm436_vm7, %v401_v10  ;;  %v434_v15 = vsel %vm406_vm3, %v685_v12, 0.0  ;;  %688 = vpow2.f32 %v430_v11 }
  0xb5   : > { %v395_v18 = vadd.f32 1.0, %v391_v13  ;;  %449 = vrot.lane.b32.xlu1 %v434_v15, %s700_s20  ;;  %v433_v19 = vsel %vm405_vm4, %v687_v14, 0.0 }
  0xb6   : > { %447 = vrot.lane.b32.xlu0 %v433_v19, %s700_s20 }
  0xb7   : > { %v399_v21 = vsel %vm383_vm10, %v387_v16, %v395_v18 }
  0xb8   : > { %v403_v22 = vmul.f32 %v399_v21, %v293_v47  ;;  %493 = vrot.lane.b32.xlu2 %v399_v21, %s699_s19 }
  0xba   : > { %v689_v23 = vpop.eup %688  ;;  %440 = vst.msk [vmem:[%s807_s18 + $0x18] sm:$0xff] %vm436_vm7, %v403_v22 }
  0xbb   : > { %v435_v17 = vsel %vm407_vm5, %v689_v23, 0.0 }
  0xbd   : > { %451 = vrot.lane.b32.xlu1 %v435_v17, %s700_s20 }
  0xbe   : > { %489 = vrot.lane.b32.xlu0 %v397_v8, %s699_s19 }
  0xc5   : > { %491 = vrot.lane.b32.xlu1 %v398_v3, %s699_s19 }
  0xf4   : > { %v467_v20 = vpop.permute.xlu2 %466 }
  0xfc   : > { %v469_v24 = vpop.permute.xlu2 %468 }
 0x104   : > { %v488_v28 = vpop.permute.xlu2 %487 }
 0x112   : > { %v471_v25 = vpop.permute.xlu0 %470  ;;  %v494_v33 = vpop.permute.xlu2 %493 }
 0x11a   : > { %v473_v26 = vpop.permute.xlu1 %472 }
 0x11f   : > { %v446_v27 = vpop.permute.xlu0 %445 }
 0x120   : > { %458 = vst.msk [vmem:[%s807_s18] sm:$0xff] %vm457_vm11, %v446_v27 }
 0x121   : > { %479 = vst.msk [vmem:[%s807_s18] sm:$0xff] %vm478_vm12, %v467_v20 }
 0x122   : > { %500 = vst.msk [vmem:[%s807_s18] sm:$0xff] %vm499_vm13, %v488_v28 }
 0x127   : > { %v450_v29 = vpop.permute.xlu1 %449 }
 0x128   : > { %460 = vst.msk [vmem:[%s807_s18 + $0x10] sm:$0xff] %vm457_vm11, %v450_v29  ;;  %v448_v30 = vpop.permute.xlu0 %447 }
 0x129   : > { %481 = vst.msk [vmem:[%s807_s18 + $0x10] sm:$0xff] %vm478_vm12, %v471_v25 }
 0x12a   : > { %459 = vst.msk [vmem:[%s807_s18 + $0x8] sm:$0xff] %vm457_vm11, %v448_v30 }
 0x12b   : > { %480 = vst.msk [vmem:[%s807_s18 + $0x8] sm:$0xff] %vm478_vm12, %v469_v24 }
 0x12f   : > { %v452_v31 = vpop.permute.xlu1 %451 }
 0x130   : > { %461 = vst.msk [vmem:[%s807_s18 + $0x18] sm:$0xff] %vm457_vm11, %v452_v31  ;;  %v490_v32 = vpop.permute.xlu0 %489 }
 0x131   : > { %482 = vst.msk [vmem:[%s807_s18 + $0x18] sm:$0xff] %vm478_vm12, %v473_v26 }
 0x132   : > { %501 = vst.msk [vmem:[%s807_s18 + $0x8] sm:$0xff] %vm499_vm13, %v490_v32 }
 0x133   : > { %503 = vst.msk [vmem:[%s807_s18 + $0x18] sm:$0xff] %vm499_vm13, %v494_v33 }
 0x137   : > { %v492_v34 = vpop.permute.xlu1 %491 }
 0x138   : > { %502 = vst.msk [vmem:[%s807_s18 + $0x10] sm:$0xff] %vm499_vm13, %v492_v34 }
 0x139 PF: > { %s14_s15 = sadd.s32 1, %s696_s15  }
 0x13a   : > { %p11_p4 = scmp.ge.s32.totalorder %s14_s15, 6  }
 0x13c   :  { %13 = sbr.rel (!%p11_p4) target bundleno = 1 (0x1), region = 69 }

</bundles_post_ra>
